<compile_context>
chip_gen: v6e
topology: v6e:2x2x1
jax: 0.10.0
libtpu: 0.0.40
codegen_flags: <defaults>
</compile_context>

<pallas_src>
import functools

import jax
import jax.numpy as jnp
from jax.experimental import pallas as pl
from jax.experimental.pallas import tpu as pltpu


# ----------------------------------------------------------------------------
# Fused kernel
# ----------------------------------------------------------------------------
def _fused_contrastive_kernel(lab_col_ref, lab_row_ref, v_ref, a_ref, t_ref,
                              out_ref, *, dividing_line, gain, inv_temp):
    n = v_ref.shape[0]
    inv_n = 1.0 / float(n)

    def l2_normalize(x_ref):
        # F.normalize(x, dim=1): x / max(||x||_2, 1e-12)
        #                      == x * rsqrt(max(||x||_2^2, 1e-24))
        x = x_ref[...].astype(jnp.float32)
        ss = jnp.sum(x * x, axis=1, keepdims=True)
        return x * jax.lax.rsqrt(jnp.maximum(ss, 1e-24))

    # Each modality normalized exactly once.
    vn = l2_normalize(v_ref)
    an = l2_normalize(a_ref)
    tn = l2_normalize(t_ref)

    # Supervised masks from the (remapped) labels, built once, reused 6 times.
    col = jnp.broadcast_to(lab_col_ref[...], (n, n))   # (N,1) -> (N,N)
    row = jnp.broadcast_to(lab_row_ref[...], (n, n))   # (1,N) -> (N,N)
    dist = jnp.abs(col - row)
    is_pos = dist <= dividing_line
    pos_m = -jnp.tanh(dist - 2.0 * dividing_line) * gain
    neg_m = jnp.tanh(dist) * gain
    # Pos/neg masks are disjoint -> one combined scale, one exp per element.
    # (get_negative_pair multiplies by 0.8 before the temperature division.)
    scale = jnp.where(is_pos, pos_m, 0.8 * neg_m) * inv_temp

    def masked_exp(x, y):
        # (N, D) x (N, D) -> (N, N) on the MXU; contraction on the feature
        # axis of both operands so no transpose is materialized.
        sim = jax.lax.dot_general(
            x, y, (((1,), (1,)), ((), ())),
            preferred_element_type=jnp.float32,
            precision=jax.lax.Precision.HIGHEST)
        e = jnp.exp(sim * scale)
        ep = jnp.where(is_pos, e, 1.0)   # == exp(sim * pos_mask / T)
        en = jnp.where(is_pos, 1.0, e)   # == exp(sim * neg_mask * 0.8 / T)
        return ep, en

    def row_sums(ep, en):
        return (jnp.sum(ep, axis=1, keepdims=True),    # (N, 1)
                jnp.sum(en, axis=1, keepdims=True))

    def col_sums(ep, en):
        return (jnp.sum(ep, axis=0, keepdims=True),    # (1, N)
                jnp.sum(en, axis=0, keepdims=True))

    # Inter-modal blocks: row sums feed direction 1 (x @ y.T); column sums are
    # exactly the row sums of direction 2 (y @ x.T) because the masks and
    # |label_i - label_j| distances are symmetric.
    ep, en = masked_exp(vn, an)                         # v @ a.T
    rp_va, rn_va = row_sums(ep, en)
    cp_va, cn_va = col_sums(ep, en)
    ep, en = masked_exp(vn, tn)                         # v @ t.T
    rp_vt, rn_vt = row_sums(ep, en)
    cp_vt, cn_vt = col_sums(ep, en)
    ep, en = masked_exp(tn, an)                         # t @ a.T
    rp_ta, rn_ta = row_sums(ep, en)
    cp_ta, cn_ta = col_sums(ep, en)

    # Intra-modal blocks (symmetric => row sums == column sums); each computed
    # once and only in the layouts that are consumed downstream.
    ep, en = masked_exp(vn, vn)                         # v @ v.T
    rp_vv, rn_vv = row_sums(ep, en)
    ep, en = masked_exp(an, an)                         # a @ a.T
    cp_aa, cn_aa = col_sums(ep, en)
    ep, en = masked_exp(tn, tn)                         # t @ t.T
    rp_tt, rn_tt = row_sums(ep, en)
    cp_tt, cn_tt = col_sums(ep, en)

    def dir_loss(p_inter, n_inter, p_intra, n_intra):
        # compute_contrastive_loss: mean_i( -log( sum_pos_i / sum_all_i ) )
        mol = p_inter + p_intra
        den = mol + n_inter + n_intra
        nll = -jnp.log(mol / den)
        s = jnp.sum(nll, axis=1, keepdims=True)
        s = jnp.sum(s, axis=0, keepdims=True)           # (1, 1)
        return s * inv_n

    # compute_single_loss(x, y) = (dir1 + dir2) / 2
    va_loss = 0.5 * (dir_loss(rp_va, rn_va, rp_vv, rn_vv)
                     + dir_loss(cp_va, cn_va, cp_aa, cn_aa))
    vt_loss = 0.5 * (dir_loss(rp_vt, rn_vt, rp_vv, rn_vv)
                     + dir_loss(cp_vt, cn_vt, cp_tt, cn_tt))
    ta_loss = 0.5 * (dir_loss(rp_ta, rn_ta, rp_tt, rn_tt)
                     + dir_loss(cp_ta, cn_ta, cp_aa, cn_aa))

    out_ref[...] = va_loss + vt_loss + ta_loss


# ----------------------------------------------------------------------------
# Wrapper
# ----------------------------------------------------------------------------
def contrastive_loss_forward(outputs, label_map, *,
                             dataset_name="mosi", dividing_line=0.5,
                             gain=1.5, temperature=0.03):
    """Pallas equivalent of contrastive_loss.forward (single fused kernel)."""
    v = outputs["Feature_v"]
    a = outputs["Feature_a"]
    t = outputs["Feature_t"]
    n, d = v.shape

    # label_map_reconstruction (O(N), done on the tiny label vector only).
    lab = label_map.astype(jnp.float32).reshape(n)
    if dataset_name != "simsv2":
        lab = (lab + 3.0) / 3.0 - 1.0
    lab_col = lab.reshape(n, 1)
    lab_row = lab.reshape(1, n)

    kernel = functools.partial(_fused_contrastive_kernel,
                               dividing_line=float(dividing_line),
                               gain=float(gain),
                               inv_temp=1.0 / float(temperature))

    loss = pl.pallas_call(
        kernel,
        out_shape=jax.ShapeDtypeStruct((1, 1), jnp.float32),
        grid=(1,),
        in_specs=[pl.BlockSpec((n, 1), lambda i: (0, 0)),
                  pl.BlockSpec((1, n), lambda i: (0, 0)),
                  pl.BlockSpec((n, d), lambda i: (0, 0)),
                  pl.BlockSpec((n, d), lambda i: (0, 0)),
                  pl.BlockSpec((n, d), lambda i: (0, 0))],
        out_specs=pl.BlockSpec((1, 1), lambda i: (0, 0)),
        compiler_params=pltpu.CompilerParams(
            dimension_semantics=("arbitrary",),
            vmem_limit_bytes=64 * 1024 * 1024),
    )(lab_col, lab_row, v, a, t)
    return loss[0, 0]


# ----------------------------------------------------------------------------
# Pure-JAX reference (direct transcription of the PyTorch module) for checking
# ----------------------------------------------------------------------------
def _reference_loss(outputs, label_map, *, dataset_name, dividing_line,
                    gain, temperature):
    def normalize(x):
        nrm = jnp.sqrt(jnp.sum(x * x, axis=1, keepdims=True))
        return x / jnp.maximum(nrm, 1e-12)

    lab = label_map.astype(jnp.float32)
    if dataset_name != "simsv2":
        lab = (lab + 3.0) / 3.0 - 1.0
    dist = jnp.abs(lab[:, None] - lab[None, :])
    pos_mask = jnp.where(dist <= dividing_line,
                         -jnp.tanh(dist - dividing_line * 2.0) * gain, 0.0)
    neg_mask = jnp.where(dist > dividing_line, jnp.tanh(dist) * gain, 0.0)

    def pair_sums(x, y):
        sim = jnp.dot(x, y.T, precision=jax.lax.Precision.HIGHEST)
        pos = jnp.exp(sim * pos_mask / temperature)
        neg = jnp.exp(sim * neg_mask * 0.8 / temperature)
        return pos.sum(axis=1), neg.sum(axis=1)

    def single(x, y):
        xn, yn = normalize(x), normalize(y)
        ip1, in1 = pair_sums(xn, yn)
        ip2, in2 = pair_sums(yn, xn)
        sp1, sn1 = pair_sums(xn, xn)
        sp2, sn2 = pair_sums(yn, yn)
        l1 = jnp.mean(-jnp.log((ip1 + sp1) / (ip1 + sp1 + in1 + sn1)))
        l2 = jnp.mean(-jnp.log((ip2 + sp2) / (ip2 + sp2 + in2 + sn2)))
        return (l1 + l2) / 2.0

    v = outputs["Feature_v"].astype(jnp.float32)
    a = outputs["Feature_a"].astype(jnp.float32)
    t = outputs["Feature_t"].astype(jnp.float32)
    return single(v, a) + single(v, t) + single(t, a)


# ----------------------------------------------------------------------------
# Demo
# ----------------------------------------------------------------------------
if __name__ == "__main__":
    N, D = 8, 32  # batch size, feature dim

    key = jax.random.PRNGKey(0)
    kv, ka, kt, kl = jax.random.split(key, 4)
    outputs = {
        "Feature_v": jax.random.normal(kv, (N, D), dtype=jnp.float32),
        "Feature_a": jax.random.normal(ka, (N, D), dtype=jnp.float32),
        "Feature_t": jax.random.normal(kt, (N, D), dtype=jnp.float32),
    }
    # Sentiment-style labels in [-3, 3] (remapped to [-1, 1] inside).
    label_map = jax.random.uniform(kl, (N,), minval=-3.0, maxval=3.0,
                                   dtype=jnp.float32)

    loss = contrastive_loss_forward(outputs, label_map,
                                    dataset_name="mosi",
                                    dividing_line=0.5,
                                    gain=1.5,
                                    temperature=0.03)
    loss = jax.block_until_ready(loss)

    ref = _reference_loss(outputs, label_map,
                          dataset_name="mosi",
                          dividing_line=0.5,
                          gain=1.5,
                          temperature=0.03)
    ref = jax.block_until_ready(ref)

    assert jnp.isfinite(loss), "loss is not finite"
    assert jnp.allclose(loss, ref, rtol=1e-2, atol=1e-2), (loss, ref)
    print("KERNEL_OK")
</pallas_src>

<mosaic_0001>
module attributes {stable_mosaic.version = 11 : i64} {
  func.func @_fused_contrastive_kernel(%arg0: i32, %arg1: memref<8x1xf32, #tpu.memory_space<vmem>>, %arg2: memref<1x8xf32, #tpu.memory_space<vmem>>, %arg3: memref<8x32xf32, #tpu.memory_space<vmem>>, %arg4: memref<8x32xf32, #tpu.memory_space<vmem>>, %arg5: memref<8x32xf32, #tpu.memory_space<vmem>>, %arg6: memref<1x1xf32, #tpu.memory_space<vmem>>) attributes {dimension_semantics = [#tpu.dimension_semantics<arbitrary>], iteration_bounds = array<i64: 1>, scalar_prefetch = 0 : i64, scratch_operands = 0 : i64, tpu.core_type = #tpu.core_type<tc>, window_params = [{pipeline_mode = #tpu.pipeline_mode<synchronous>, transform_indices = @transform_0, window_bounds = array<i64: 8, 1>}, {pipeline_mode = #tpu.pipeline_mode<synchronous>, transform_indices = @transform_1, window_bounds = array<i64: 1, 8>}, {pipeline_mode = #tpu.pipeline_mode<synchronous>, transform_indices = @transform_2, window_bounds = array<i64: 8, 32>}, {pipeline_mode = #tpu.pipeline_mode<synchronous>, transform_indices = @transform_3, window_bounds = array<i64: 8, 32>}, {pipeline_mode = #tpu.pipeline_mode<synchronous>, transform_indices = @transform_4, window_bounds = array<i64: 8, 32>}, {pipeline_mode = #tpu.pipeline_mode<synchronous>, transform_indices = @transform_5, window_bounds = array<i64: 1, 1>}]} {
    %c0 = arith.constant 0 : index
    %c0_0 = arith.constant 0 : index
    %0 = vector.load %arg3[%c0, %c0_0] : memref<8x32xf32, #tpu.memory_space<vmem>>, vector<8x32xf32>
    %1 = arith.mulf %0, %0 : vector<8x32xf32>
    %cst = arith.constant dense<0.000000e+00> : vector<8xf32>
    %2 = vector.multi_reduction <add>, %1, %cst [1] : vector<8x32xf32> to vector<8xf32>
    %3 = vector.shape_cast %2 : vector<8xf32> to vector<8x1xf32>
    %cst_1 = arith.constant 1.000000e-24 : f32
    %4 = vector.broadcast %cst_1 : f32 to vector<8x1xf32>
    %5 = arith.maximumf %3, %4 : vector<8x1xf32>
    %6 = math.rsqrt %5 : vector<8x1xf32>
    %7 = vector.broadcast %6 : vector<8x1xf32> to vector<8x32xf32>
    %8 = arith.mulf %0, %7 : vector<8x32xf32>
    %c0_2 = arith.constant 0 : index
    %c0_3 = arith.constant 0 : index
    %9 = vector.load %arg4[%c0_2, %c0_3] : memref<8x32xf32, #tpu.memory_space<vmem>>, vector<8x32xf32>
    %10 = arith.mulf %9, %9 : vector<8x32xf32>
    %cst_4 = arith.constant dense<0.000000e+00> : vector<8xf32>
    %11 = vector.multi_reduction <add>, %10, %cst_4 [1] : vector<8x32xf32> to vector<8xf32>
    %12 = vector.shape_cast %11 : vector<8xf32> to vector<8x1xf32>
    %cst_5 = arith.constant 1.000000e-24 : f32
    %13 = vector.broadcast %cst_5 : f32 to vector<8x1xf32>
    %14 = arith.maximumf %12, %13 : vector<8x1xf32>
    %15 = math.rsqrt %14 : vector<8x1xf32>
    %16 = vector.broadcast %15 : vector<8x1xf32> to vector<8x32xf32>
    %17 = arith.mulf %9, %16 : vector<8x32xf32>
    %c0_6 = arith.constant 0 : index
    %c0_7 = arith.constant 0 : index
    %18 = vector.load %arg5[%c0_6, %c0_7] : memref<8x32xf32, #tpu.memory_space<vmem>>, vector<8x32xf32>
    %19 = arith.mulf %18, %18 : vector<8x32xf32>
    %cst_8 = arith.constant dense<0.000000e+00> : vector<8xf32>
    %20 = vector.multi_reduction <add>, %19, %cst_8 [1] : vector<8x32xf32> to vector<8xf32>
    %21 = vector.shape_cast %20 : vector<8xf32> to vector<8x1xf32>
    %cst_9 = arith.constant 1.000000e-24 : f32
    %22 = vector.broadcast %cst_9 : f32 to vector<8x1xf32>
    %23 = arith.maximumf %21, %22 : vector<8x1xf32>
    %24 = math.rsqrt %23 : vector<8x1xf32>
    %25 = vector.broadcast %24 : vector<8x1xf32> to vector<8x32xf32>
    %26 = arith.mulf %18, %25 : vector<8x32xf32>
    %c0_10 = arith.constant 0 : index
    %c0_11 = arith.constant 0 : index
    %27 = vector.load %arg1[%c0_10, %c0_11] : memref<8x1xf32, #tpu.memory_space<vmem>>, vector<8x1xf32>
    %28 = vector.shape_cast %27 : vector<8x1xf32> to vector<8x1xf32>
    %29 = vector.broadcast %28 : vector<8x1xf32> to vector<8x8xf32>
    %c0_12 = arith.constant 0 : index
    %c0_13 = arith.constant 0 : index
    %30 = vector.load %arg2[%c0_12, %c0_13] : memref<1x8xf32, #tpu.memory_space<vmem>>, vector<1x8xf32>
    %31 = vector.shape_cast %30 : vector<1x8xf32> to vector<1x8xf32>
    %32 = vector.broadcast %31 : vector<1x8xf32> to vector<8x8xf32>
    %33 = arith.subf %29, %32 : vector<8x8xf32>
    %34 = math.absf %33 : vector<8x8xf32>
    %cst_14 = arith.constant 5.000000e-01 : f32
    %35 = vector.broadcast %cst_14 : f32 to vector<8x8xf32>
    %36 = arith.cmpf ole, %34, %35 : vector<8x8xf32>
    %cst_15 = arith.constant 1.000000e+00 : f32
    %37 = vector.broadcast %cst_15 : f32 to vector<8x8xf32>
    %38 = arith.subf %34, %37 : vector<8x8xf32>
    %39 = math.tanh %38 : vector<8x8xf32>
    %cst_16 = arith.constant 0.000000e+00 : f32
    %40 = vector.broadcast %cst_16 : f32 to vector<8x8xf32>
    %41 = arith.subf %40, %39 : vector<8x8xf32>
    %cst_17 = arith.constant 1.500000e+00 : f32
    %42 = vector.broadcast %cst_17 : f32 to vector<8x8xf32>
    %43 = arith.mulf %41, %42 : vector<8x8xf32>
    %44 = math.tanh %34 : vector<8x8xf32>
    %cst_18 = arith.constant 1.500000e+00 : f32
    %45 = vector.broadcast %cst_18 : f32 to vector<8x8xf32>
    %46 = arith.mulf %44, %45 : vector<8x8xf32>
    %cst_19 = arith.constant 8.000000e-01 : f32
    %47 = vector.broadcast %cst_19 : f32 to vector<8x8xf32>
    %48 = arith.mulf %47, %46 : vector<8x8xf32>
    %49 = arith.select %36, %43, %48 : vector<8x8xi1>, vector<8x8xf32>
    %cst_20 = arith.constant 33.3333321 : f32
    %50 = vector.broadcast %cst_20 : f32 to vector<8x8xf32>
    %51 = arith.mulf %49, %50 : vector<8x8xf32>
    %cst_21 = arith.constant dense<0.000000e+00> : vector<8x8xf32>
    %52 = tpu.matmul %8, %17, %cst_21 {dimension_numbers = #tpu.dot_dimension_numbers<[1], [1], [0], [0], [0, 0, 1, 0], [], []>, precision = #tpu.contract_precision<fp32>} : vector<8x32xf32>, vector<8x32xf32>, vector<8x8xf32> -> vector<8x8xf32>
    %53 = arith.mulf %52, %51 : vector<8x8xf32>
    %54 = math.exp %53 : vector<8x8xf32>
    %cst_22 = arith.constant 1.000000e+00 : f32
    %55 = vector.broadcast %cst_22 : f32 to vector<8x8xf32>
    %56 = arith.select %36, %54, %55 : vector<8x8xi1>, vector<8x8xf32>
    %cst_23 = arith.constant 1.000000e+00 : f32
    %57 = vector.broadcast %cst_23 : f32 to vector<8x8xf32>
    %58 = arith.select %36, %57, %54 : vector<8x8xi1>, vector<8x8xf32>
    %cst_24 = arith.constant dense<0.000000e+00> : vector<8xf32>
    %59 = vector.multi_reduction <add>, %56, %cst_24 [1] : vector<8x8xf32> to vector<8xf32>
    %60 = vector.shape_cast %59 : vector<8xf32> to vector<8x1xf32>
    %cst_25 = arith.constant dense<0.000000e+00> : vector<8xf32>
    %61 = vector.multi_reduction <add>, %58, %cst_25 [1] : vector<8x8xf32> to vector<8xf32>
    %62 = vector.shape_cast %61 : vector<8xf32> to vector<8x1xf32>
    %cst_26 = arith.constant dense<0.000000e+00> : vector<8xf32>
    %63 = vector.multi_reduction <add>, %56, %cst_26 [0] : vector<8x8xf32> to vector<8xf32>
    %64 = vector.shape_cast %63 : vector<8xf32> to vector<1x8xf32>
    %cst_27 = arith.constant dense<0.000000e+00> : vector<8xf32>
    %65 = vector.multi_reduction <add>, %58, %cst_27 [0] : vector<8x8xf32> to vector<8xf32>
    %66 = vector.shape_cast %65 : vector<8xf32> to vector<1x8xf32>
    %cst_28 = arith.constant dense<0.000000e+00> : vector<8x8xf32>
    %67 = tpu.matmul %8, %26, %cst_28 {dimension_numbers = #tpu.dot_dimension_numbers<[1], [1], [0], [0], [0, 0, 1, 0], [], []>, precision = #tpu.contract_precision<fp32>} : vector<8x32xf32>, vector<8x32xf32>, vector<8x8xf32> -> vector<8x8xf32>
    %68 = arith.mulf %67, %51 : vector<8x8xf32>
    %69 = math.exp %68 : vector<8x8xf32>
    %cst_29 = arith.constant 1.000000e+00 : f32
    %70 = vector.broadcast %cst_29 : f32 to vector<8x8xf32>
    %71 = arith.select %36, %69, %70 : vector<8x8xi1>, vector<8x8xf32>
    %cst_30 = arith.constant 1.000000e+00 : f32
    %72 = vector.broadcast %cst_30 : f32 to vector<8x8xf32>
    %73 = arith.select %36, %72, %69 : vector<8x8xi1>, vector<8x8xf32>
    %cst_31 = arith.constant dense<0.000000e+00> : vector<8xf32>
    %74 = vector.multi_reduction <add>, %71, %cst_31 [1] : vector<8x8xf32> to vector<8xf32>
    %75 = vector.shape_cast %74 : vector<8xf32> to vector<8x1xf32>
    %cst_32 = arith.constant dense<0.000000e+00> : vector<8xf32>
    %76 = vector.multi_reduction <add>, %73, %cst_32 [1] : vector<8x8xf32> to vector<8xf32>
    %77 = vector.shape_cast %76 : vector<8xf32> to vector<8x1xf32>
    %cst_33 = arith.constant dense<0.000000e+00> : vector<8xf32>
    %78 = vector.multi_reduction <add>, %71, %cst_33 [0] : vector<8x8xf32> to vector<8xf32>
    %79 = vector.shape_cast %78 : vector<8xf32> to vector<1x8xf32>
    %cst_34 = arith.constant dense<0.000000e+00> : vector<8xf32>
    %80 = vector.multi_reduction <add>, %73, %cst_34 [0] : vector<8x8xf32> to vector<8xf32>
    %81 = vector.shape_cast %80 : vector<8xf32> to vector<1x8xf32>
    %cst_35 = arith.constant dense<0.000000e+00> : vector<8x8xf32>
    %82 = tpu.matmul %26, %17, %cst_35 {dimension_numbers = #tpu.dot_dimension_numbers<[1], [1], [0], [0], [0, 0, 1, 0], [], []>, precision = #tpu.contract_precision<fp32>} : vector<8x32xf32>, vector<8x32xf32>, vector<8x8xf32> -> vector<8x8xf32>
    %83 = arith.mulf %82, %51 : vector<8x8xf32>
    %84 = math.exp %83 : vector<8x8xf32>
    %cst_36 = arith.constant 1.000000e+00 : f32
    %85 = vector.broadcast %cst_36 : f32 to vector<8x8xf32>
    %86 = arith.select %36, %84, %85 : vector<8x8xi1>, vector<8x8xf32>
    %cst_37 = arith.constant 1.000000e+00 : f32
    %87 = vector.broadcast %cst_37 : f32 to vector<8x8xf32>
    %88 = arith.select %36, %87, %84 : vector<8x8xi1>, vector<8x8xf32>
    %cst_38 = arith.constant dense<0.000000e+00> : vector<8xf32>
    %89 = vector.multi_reduction <add>, %86, %cst_38 [1] : vector<8x8xf32> to vector<8xf32>
    %90 = vector.shape_cast %89 : vector<8xf32> to vector<8x1xf32>
    %cst_39 = arith.constant dense<0.000000e+00> : vector<8xf32>
    %91 = vector.multi_reduction <add>, %88, %cst_39 [1] : vector<8x8xf32> to vector<8xf32>
    %92 = vector.shape_cast %91 : vector<8xf32> to vector<8x1xf32>
    %cst_40 = arith.constant dense<0.000000e+00> : vector<8xf32>
    %93 = vector.multi_reduction <add>, %86, %cst_40 [0] : vector<8x8xf32> to vector<8xf32>
    %94 = vector.shape_cast %93 : vector<8xf32> to vector<1x8xf32>
    %cst_41 = arith.constant dense<0.000000e+00> : vector<8xf32>
    %95 = vector.multi_reduction <add>, %88, %cst_41 [0] : vector<8x8xf32> to vector<8xf32>
    %96 = vector.shape_cast %95 : vector<8xf32> to vector<1x8xf32>
    %cst_42 = arith.constant dense<0.000000e+00> : vector<8x8xf32>
    %97 = tpu.matmul %8, %8, %cst_42 {dimension_numbers = #tpu.dot_dimension_numbers<[1], [1], [0], [0], [0, 0, 1, 0], [], []>, precision = #tpu.contract_precision<fp32>} : vector<8x32xf32>, vector<8x32xf32>, vector<8x8xf32> -> vector<8x8xf32>
    %98 = arith.mulf %97, %51 : vector<8x8xf32>
    %99 = math.exp %98 : vector<8x8xf32>
    %cst_43 = arith.constant 1.000000e+00 : f32
    %100 = vector.broadcast %cst_43 : f32 to vector<8x8xf32>
    %101 = arith.select %36, %99, %100 : vector<8x8xi1>, vector<8x8xf32>
    %cst_44 = arith.constant 1.000000e+00 : f32
    %102 = vector.broadcast %cst_44 : f32 to vector<8x8xf32>
    %103 = arith.select %36, %102, %99 : vector<8x8xi1>, vector<8x8xf32>
    %cst_45 = arith.constant dense<0.000000e+00> : vector<8xf32>
    %104 = vector.multi_reduction <add>, %101, %cst_45 [1] : vector<8x8xf32> to vector<8xf32>
    %105 = vector.shape_cast %104 : vector<8xf32> to vector<8x1xf32>
    %cst_46 = arith.constant dense<0.000000e+00> : vector<8xf32>
    %106 = vector.multi_reduction <add>, %103, %cst_46 [1] : vector<8x8xf32> to vector<8xf32>
    %107 = vector.shape_cast %106 : vector<8xf32> to vector<8x1xf32>
    %cst_47 = arith.constant dense<0.000000e+00> : vector<8x8xf32>
    %108 = tpu.matmul %17, %17, %cst_47 {dimension_numbers = #tpu.dot_dimension_numbers<[1], [1], [0], [0], [0, 0, 1, 0], [], []>, precision = #tpu.contract_precision<fp32>} : vector<8x32xf32>, vector<8x32xf32>, vector<8x8xf32> -> vector<8x8xf32>
    %109 = arith.mulf %108, %51 : vector<8x8xf32>
    %110 = math.exp %109 : vector<8x8xf32>
    %cst_48 = arith.constant 1.000000e+00 : f32
    %111 = vector.broadcast %cst_48 : f32 to vector<8x8xf32>
    %112 = arith.select %36, %110, %111 : vector<8x8xi1>, vector<8x8xf32>
    %cst_49 = arith.constant 1.000000e+00 : f32
    %113 = vector.broadcast %cst_49 : f32 to vector<8x8xf32>
    %114 = arith.select %36, %113, %110 : vector<8x8xi1>, vector<8x8xf32>
    %cst_50 = arith.constant dense<0.000000e+00> : vector<8xf32>
    %115 = vector.multi_reduction <add>, %112, %cst_50 [0] : vector<8x8xf32> to vector<8xf32>
    %116 = vector.shape_cast %115 : vector<8xf32> to vector<1x8xf32>
    %cst_51 = arith.constant dense<0.000000e+00> : vector<8xf32>
    %117 = vector.multi_reduction <add>, %114, %cst_51 [0] : vector<8x8xf32> to vector<8xf32>
    %118 = vector.shape_cast %117 : vector<8xf32> to vector<1x8xf32>
    %cst_52 = arith.constant dense<0.000000e+00> : vector<8x8xf32>
    %119 = tpu.matmul %26, %26, %cst_52 {dimension_numbers = #tpu.dot_dimension_numbers<[1], [1], [0], [0], [0, 0, 1, 0], [], []>, precision = #tpu.contract_precision<fp32>} : vector<8x32xf32>, vector<8x32xf32>, vector<8x8xf32> -> vector<8x8xf32>
    %120 = arith.mulf %119, %51 : vector<8x8xf32>
    %121 = math.exp %120 : vector<8x8xf32>
    %cst_53 = arith.constant 1.000000e+00 : f32
    %122 = vector.broadcast %cst_53 : f32 to vector<8x8xf32>
    %123 = arith.select %36, %121, %122 : vector<8x8xi1>, vector<8x8xf32>
    %cst_54 = arith.constant 1.000000e+00 : f32
    %124 = vector.broadcast %cst_54 : f32 to vector<8x8xf32>
    %125 = arith.select %36, %124, %121 : vector<8x8xi1>, vector<8x8xf32>
    %cst_55 = arith.constant dense<0.000000e+00> : vector<8xf32>
    %126 = vector.multi_reduction <add>, %123, %cst_55 [1] : vector<8x8xf32> to vector<8xf32>
    %127 = vector.shape_cast %126 : vector<8xf32> to vector<8x1xf32>
    %cst_56 = arith.constant dense<0.000000e+00> : vector<8xf32>
    %128 = vector.multi_reduction <add>, %125, %cst_56 [1] : vector<8x8xf32> to vector<8xf32>
    %129 = vector.shape_cast %128 : vector<8xf32> to vector<8x1xf32>
    %cst_57 = arith.constant dense<0.000000e+00> : vector<8xf32>
    %130 = vector.multi_reduction <add>, %123, %cst_57 [0] : vector<8x8xf32> to vector<8xf32>
    %131 = vector.shape_cast %130 : vector<8xf32> to vector<1x8xf32>
    %cst_58 = arith.constant dense<0.000000e+00> : vector<8xf32>
    %132 = vector.multi_reduction <add>, %125, %cst_58 [0] : vector<8x8xf32> to vector<8xf32>
    %133 = vector.shape_cast %132 : vector<8xf32> to vector<1x8xf32>
    %134 = arith.addf %60, %105 : vector<8x1xf32>
    %135 = arith.addf %134, %62 : vector<8x1xf32>
    %136 = arith.addf %135, %107 : vector<8x1xf32>
    %137 = arith.divf %134, %136 : vector<8x1xf32>
    %138 = math.log %137 : vector<8x1xf32>
    %cst_59 = arith.constant 0.000000e+00 : f32
    %139 = vector.broadcast %cst_59 : f32 to vector<8x1xf32>
    %140 = arith.subf %139, %138 : vector<8x1xf32>
    %cst_60 = arith.constant dense<0.000000e+00> : vector<8xf32>
    %141 = vector.multi_reduction <add>, %140, %cst_60 [1] : vector<8x1xf32> to vector<8xf32>
    %142 = vector.shape_cast %141 : vector<8xf32> to vector<8x1xf32>
    %cst_61 = arith.constant dense<0.000000e+00> : vector<1xf32>
    %143 = vector.multi_reduction <add>, %142, %cst_61 [0] : vector<8x1xf32> to vector<1xf32>
    %144 = vector.shape_cast %143 : vector<1xf32> to vector<1x1xf32>
    %cst_62 = arith.constant 1.250000e-01 : f32
    %145 = vector.broadcast %cst_62 : f32 to vector<1x1xf32>
    %146 = arith.mulf %144, %145 : vector<1x1xf32>
    %147 = arith.addf %64, %116 : vector<1x8xf32>
    %148 = arith.addf %147, %66 : vector<1x8xf32>
    %149 = arith.addf %148, %118 : vector<1x8xf32>
    %150 = arith.divf %147, %149 : vector<1x8xf32>
    %151 = math.log %150 : vector<1x8xf32>
    %cst_63 = arith.constant 0.000000e+00 : f32
    %152 = vector.broadcast %cst_63 : f32 to vector<1x8xf32>
    %153 = arith.subf %152, %151 : vector<1x8xf32>
    %cst_64 = arith.constant dense<0.000000e+00> : vector<1xf32>
    %154 = vector.multi_reduction <add>, %153, %cst_64 [1] : vector<1x8xf32> to vector<1xf32>
    %155 = vector.shape_cast %154 : vector<1xf32> to vector<1x1xf32>
    %cst_65 = arith.constant dense<0.000000e+00> : vector<1xf32>
    %156 = vector.multi_reduction <add>, %155, %cst_65 [0] : vector<1x1xf32> to vector<1xf32>
    %157 = vector.shape_cast %156 : vector<1xf32> to vector<1x1xf32>
    %cst_66 = arith.constant 1.250000e-01 : f32
    %158 = vector.broadcast %cst_66 : f32 to vector<1x1xf32>
    %159 = arith.mulf %157, %158 : vector<1x1xf32>
    %160 = arith.addf %146, %159 : vector<1x1xf32>
    %cst_67 = arith.constant 5.000000e-01 : f32
    %161 = vector.broadcast %cst_67 : f32 to vector<1x1xf32>
    %162 = arith.mulf %161, %160 : vector<1x1xf32>
    %163 = arith.addf %75, %105 : vector<8x1xf32>
    %164 = arith.addf %163, %77 : vector<8x1xf32>
    %165 = arith.addf %164, %107 : vector<8x1xf32>
    %166 = arith.divf %163, %165 : vector<8x1xf32>
    %167 = math.log %166 : vector<8x1xf32>
    %cst_68 = arith.constant 0.000000e+00 : f32
    %168 = vector.broadcast %cst_68 : f32 to vector<8x1xf32>
    %169 = arith.subf %168, %167 : vector<8x1xf32>
    %cst_69 = arith.constant dense<0.000000e+00> : vector<8xf32>
    %170 = vector.multi_reduction <add>, %169, %cst_69 [1] : vector<8x1xf32> to vector<8xf32>
    %171 = vector.shape_cast %170 : vector<8xf32> to vector<8x1xf32>
    %cst_70 = arith.constant dense<0.000000e+00> : vector<1xf32>
    %172 = vector.multi_reduction <add>, %171, %cst_70 [0] : vector<8x1xf32> to vector<1xf32>
    %173 = vector.shape_cast %172 : vector<1xf32> to vector<1x1xf32>
    %cst_71 = arith.constant 1.250000e-01 : f32
    %174 = vector.broadcast %cst_71 : f32 to vector<1x1xf32>
    %175 = arith.mulf %173, %174 : vector<1x1xf32>
    %176 = arith.addf %79, %131 : vector<1x8xf32>
    %177 = arith.addf %176, %81 : vector<1x8xf32>
    %178 = arith.addf %177, %133 : vector<1x8xf32>
    %179 = arith.divf %176, %178 : vector<1x8xf32>
    %180 = math.log %179 : vector<1x8xf32>
    %cst_72 = arith.constant 0.000000e+00 : f32
    %181 = vector.broadcast %cst_72 : f32 to vector<1x8xf32>
    %182 = arith.subf %181, %180 : vector<1x8xf32>
    %cst_73 = arith.constant dense<0.000000e+00> : vector<1xf32>
    %183 = vector.multi_reduction <add>, %182, %cst_73 [1] : vector<1x8xf32> to vector<1xf32>
    %184 = vector.shape_cast %183 : vector<1xf32> to vector<1x1xf32>
    %cst_74 = arith.constant dense<0.000000e+00> : vector<1xf32>
    %185 = vector.multi_reduction <add>, %184, %cst_74 [0] : vector<1x1xf32> to vector<1xf32>
    %186 = vector.shape_cast %185 : vector<1xf32> to vector<1x1xf32>
    %cst_75 = arith.constant 1.250000e-01 : f32
    %187 = vector.broadcast %cst_75 : f32 to vector<1x1xf32>
    %188 = arith.mulf %186, %187 : vector<1x1xf32>
    %189 = arith.addf %175, %188 : vector<1x1xf32>
    %cst_76 = arith.constant 5.000000e-01 : f32
    %190 = vector.broadcast %cst_76 : f32 to vector<1x1xf32>
    %191 = arith.mulf %190, %189 : vector<1x1xf32>
    %192 = arith.addf %90, %127 : vector<8x1xf32>
    %193 = arith.addf %192, %92 : vector<8x1xf32>
    %194 = arith.addf %193, %129 : vector<8x1xf32>
    %195 = arith.divf %192, %194 : vector<8x1xf32>
    %196 = math.log %195 : vector<8x1xf32>
    %cst_77 = arith.constant 0.000000e+00 : f32
    %197 = vector.broadcast %cst_77 : f32 to vector<8x1xf32>
    %198 = arith.subf %197, %196 : vector<8x1xf32>
    %cst_78 = arith.constant dense<0.000000e+00> : vector<8xf32>
    %199 = vector.multi_reduction <add>, %198, %cst_78 [1] : vector<8x1xf32> to vector<8xf32>
    %200 = vector.shape_cast %199 : vector<8xf32> to vector<8x1xf32>
    %cst_79 = arith.constant dense<0.000000e+00> : vector<1xf32>
    %201 = vector.multi_reduction <add>, %200, %cst_79 [0] : vector<8x1xf32> to vector<1xf32>
    %202 = vector.shape_cast %201 : vector<1xf32> to vector<1x1xf32>
    %cst_80 = arith.constant 1.250000e-01 : f32
    %203 = vector.broadcast %cst_80 : f32 to vector<1x1xf32>
    %204 = arith.mulf %202, %203 : vector<1x1xf32>
    %205 = arith.addf %94, %116 : vector<1x8xf32>
    %206 = arith.addf %205, %96 : vector<1x8xf32>
    %207 = arith.addf %206, %118 : vector<1x8xf32>
    %208 = arith.divf %205, %207 : vector<1x8xf32>
    %209 = math.log %208 : vector<1x8xf32>
    %cst_81 = arith.constant 0.000000e+00 : f32
    %210 = vector.broadcast %cst_81 : f32 to vector<1x8xf32>
    %211 = arith.subf %210, %209 : vector<1x8xf32>
    %cst_82 = arith.constant dense<0.000000e+00> : vector<1xf32>
    %212 = vector.multi_reduction <add>, %211, %cst_82 [1] : vector<1x8xf32> to vector<1xf32>
    %213 = vector.shape_cast %212 : vector<1xf32> to vector<1x1xf32>
    %cst_83 = arith.constant dense<0.000000e+00> : vector<1xf32>
    %214 = vector.multi_reduction <add>, %213, %cst_83 [0] : vector<1x1xf32> to vector<1xf32>
    %215 = vector.shape_cast %214 : vector<1xf32> to vector<1x1xf32>
    %cst_84 = arith.constant 1.250000e-01 : f32
    %216 = vector.broadcast %cst_84 : f32 to vector<1x1xf32>
    %217 = arith.mulf %215, %216 : vector<1x1xf32>
    %218 = arith.addf %204, %217 : vector<1x1xf32>
    %cst_85 = arith.constant 5.000000e-01 : f32
    %219 = vector.broadcast %cst_85 : f32 to vector<1x1xf32>
    %220 = arith.mulf %219, %218 : vector<1x1xf32>
    %221 = arith.addf %162, %191 : vector<1x1xf32>
    %222 = arith.addf %221, %220 : vector<1x1xf32>
    %c0_86 = arith.constant 0 : index
    %c0_87 = arith.constant 0 : index
    %223 = vector.load %arg6[%c0_86, %c0_87] : memref<1x1xf32, #tpu.memory_space<vmem>>, vector<1x1xf32>
    tpu.vector_store %arg6[%c0_86, %c0_87], %222 {strides = array<i32>} : memref<1x1xf32, #tpu.memory_space<vmem>>, vector<1x1xf32>,
    return
  }
  func.func @transform_0(%arg0: i32) -> (i32, i32) {
    %c0_i32 = arith.constant 0 : i32
    %c0_i32_0 = arith.constant 0 : i32
    %c0_i32_1 = arith.constant 0 : i32
    return %c0_i32, %c0_i32_0 : i32, i32
  }
  func.func @transform_1(%arg0: i32) -> (i32, i32) {
    %c0_i32 = arith.constant 0 : i32
    %c0_i32_0 = arith.constant 0 : i32
    %c0_i32_1 = arith.constant 0 : i32
    return %c0_i32, %c0_i32_0 : i32, i32
  }
  func.func @transform_2(%arg0: i32) -> (i32, i32) {
    %c0_i32 = arith.constant 0 : i32
    %c0_i32_0 = arith.constant 0 : i32
    %c0_i32_1 = arith.constant 0 : i32
    return %c0_i32, %c0_i32_0 : i32, i32
  }
  func.func @transform_3(%arg0: i32) -> (i32, i32) {
    %c0_i32 = arith.constant 0 : i32
    %c0_i32_0 = arith.constant 0 : i32
    %c0_i32_1 = arith.constant 0 : i32
    return %c0_i32, %c0_i32_0 : i32, i32
  }
  func.func @transform_4(%arg0: i32) -> (i32, i32) {
    %c0_i32 = arith.constant 0 : i32
    %c0_i32_0 = arith.constant 0 : i32
    %c0_i32_1 = arith.constant 0 : i32
    return %c0_i32, %c0_i32_0 : i32, i32
  }
  func.func @transform_5(%arg0: i32) -> (i32, i32) {
    %c0_i32 = arith.constant 0 : i32
    %c0_i32_0 = arith.constant 0 : i32
    %c0_i32_1 = arith.constant 0 : i32
    return %c0_i32, %c0_i32_0 : i32, i32
  }
}

</mosaic_0001>

<bundles_post_ra>
// kernel: tpu_custom_call.1
= control target key start
LH: loop header
LB: loop body
LE: loop exit
PB: predicated region body
PF: predicated region fallthrough
CT: control target
= control target key end

     0   :  { %10 = vsyncpa [#allocation3], 0  ;;  %s3740_s0 = inlined_call_operand.vmem [shape: f32[8,1], index: 0, kind: input, shape index: {}]   ;;  %s3741_s1 = inlined_call_operand.hbm [shape: f32[1,8], index: 1, kind: input, shape index: {}]   ;;  %s3742_s2 = inlined_call_operand.vmem [shape: f32[8,32], index: 2, kind: input, shape index: {}]   ;;  %s3743_s3 = inlined_call_operand.hbm [shape: f32[8,32], index: 3, kind: input, shape index: {}]   ;;  %s3744_s4 = inlined_call_operand.vmem [shape: f32[8,32], index: 4, kind: input, shape index: {}]   ;;  %s3745_s5 = inlined_call_operand.hbm [shape: f32[1,1], index: 5, kind: output, shape index: {}]  }
   0x1   :  { %11 = vsyncpa [#allocation6], 0 }
   0x2   :  { %12 = vsyncpa [#allocation4], 0  ;;  %s3390_s18 = smov [#allocation2]   ;;  %s3391_s20 = smov [#allocation5]  }
   0x3   :  { %s21_s19 = sshll.u32 %s3390_s18, 4  ;;  %s33_s21 = sshll.u32 %s3391_s20, 4  ;;  %s22_s19 = int_to_ptr.vmem [resolvable:$true] %s21_s19  ;;  %s34_s21 = int_to_ptr.vmem [resolvable:$true] %s33_s21 }
   0x4   :  { %s3332_s22 = scalar_lea.vmem %s22_s19, 16  ;;  %s3336_s23 = scalar_lea.vmem %s22_s19, 32 }
   0x5   :  { %p3333_p0 = scmp.ne.s32.totalorder %s22_s19, %s3332_s22  ;;  %p3337_p1 = scmp.lt.s32.totalorder %s22_s19, %s22_s19 }
   0x6   :  { %p3338_p2 = scmp.lt.s32.totalorder %s3336_s23, %s3332_s22 }
   0x8   :  { %p3339_p3 = por %p3338_p2, %p3337_p1 }
   0xa   :  { %p3340_p4 = pnand %p3339_p3, %p3333_p0 }
   0xc   :  { %3343 = shalt.err (!%p3340_p4)
}
   0xd   :  { %24 = dma.hbm_to_vmem [thread:$0]  %s3741_s1, 16, %s22_s19, [#allocation3]  }
   0xe   :  { %s3352_s26 = scalar_lea.vmem %s34_s21, 128  ;;  %p3357_p6 = scmp.lt.s32.totalorder %s34_s21, %s34_s21 }
   0xf   :  { %p3353_p5 = scmp.ne.s32.totalorder %s34_s21, %s3352_s26  ;;  %p3358_p7 = scmp.lt.s32.totalorder %s3352_s26, %s3352_s26 }
  0x11   :  { %p3359_p8 = por %p3358_p7, %p3357_p6 }
  0x13   :  { %p3360_p9 = pnand %p3359_p8, %p3353_p5 }
  0x15   :  { %3363 = shalt.err (!%p3360_p9)
}
  0x16   :  { %36 = dma.hbm_to_vmem [thread:$0]  %s3743_s3, 128, %s34_s21, [#allocation6]  }
  0x17   :  { %3384 = dma.done.wait [#allocation3], 16  }
  0x18   :  { %3385 = vsyncadd [#allocation3], 4294967280 }
  0x19   :  { %3386 = dma.done.wait [#allocation6], 128  }
  0x1a   :  { %3387 = vsyncadd [#allocation6], 4294967168  ;;  %vm47_vm0 = vcmask 261120   ;;  %v54_v0 = vld [vmem:[#allocation5] sm:$0xff]  ;;  %v45_v1 = vld [vmem:[%s3742_s2] sm:$0xff]  ;;  %v3392_v9 = vmov 0.0  }
  0x1b   :  { %v62_v2 = vld [vmem:[%s3744_s4] sm:$0xff]  ;;  %v55_v3 = vmul.f32 %v54_v0, %v54_v0  ;;  %v46_v4 = vmul.f32 %v45_v1, %v45_v1  ;;  %3090 = vmatprep.subr.mxu0 %v3392_v9  ;;  %3095 = vmatprep.subr.mxu1 %v3392_v9  ;;  %vm3393_vm1 = vmmov 0   ;;  %v3394_v11 = vmov 0   ;;  %v3016_v42 = vld [vmem:[#allocation2] ss:$0 sm:$0xff] }
  0x1c   :  { %v63_v5 = vmul.f32 %v62_v2, %v62_v2  ;;  %3097 = vmatprep.mubr.msk.f32.mxu1 %vm3393_vm1, %v3392_v9  ;;  %3092 = vmatprep.mubr.msk.f32.mxu0 %vm3393_vm1, %v3392_v9  ;;  %v70_v10 = vld [vmem:[%s3740_s0] sm:$0xff]  ;;  %vm552_vm3 = vcmask 64512   ;;  %s3395_s0 = smov [#allocation7]   ;;  %vm2998_vm4 = vcmask 0  }
  0x1d   :  { %v56_v6 = vsel %vm47_vm0, %v55_v3, 0.0  ;;  %v48_v8 = vsel %vm47_vm0, %v46_v4, 0.0  ;;  %3276 = vset.pattern.permute.xlu1 %v3394_v11  ;;  %3277 = vset.pattern.permute.xlu0 %v3394_v11  ;;  %s3006_s4 = sshll.u32 %s3395_s0, 4  ;;  %s3007_s4 = int_to_ptr.vmem [resolvable:$true] %s3006_s4 }
  0x1e   :  { %v64_v7 = vsel %vm47_vm0, %v63_v5, 0.0  ;;  %57 = vadd.xlane.f32.xlu0 %v56_v6  ;;  %s3364_s7 = scalar_lea.vmem %s3007_s4, 16  ;;  %s3368_s8 = scalar_lea.vmem %s3007_s4, 32 }
  0x1f   :  { %65 = vadd.xlane.f32.xlu1 %v64_v7  ;;  %p3365_p10 = scmp.ne.s32.totalorder %s3007_s4, %s3364_s7  ;;  %p3369_p11 = scmp.lt.s32.totalorder %s3007_s4, %s3007_s4 }
  0x20   :  { %p3370_p12 = scmp.lt.s32.totalorder %s3368_s8, %s3364_s7 }
  0x22   :  { %49 = vadd.xlane.f32.xlu0 %v48_v8  ;;  %p3371_p13 = por %p3370_p12, %p3369_p11 }
  0x24   :  { %p3372_p0 = pnand %p3371_p13, %p3365_p10 }
  0x30   :  { %73 = vperm.xlu1 %3276, %v70_v10  }
  0xa7   :  { %v58_v12 = vpop.xlane.xlu0 %57 }
  0xa8   :  { %v66_v13 = vpop.xlane.xlu1 %65  ;;  %v59_v14 = vmax.f32 %v58_v12, 1e-24 }
  0xa9   :  { %v67_v15 = vmax.f32 %v66_v13, 1e-24 }
  0xaa   :  { %3278 = vrsqrt.f32 %v59_v14 }
  0xab   :  { %v50_v16 = vpop.xlane.xlu0 %49  ;;  %3280 = vrsqrt.f32 %v67_v15 }
  0xac   :  { %v51_v17 = vmax.f32 %v50_v16, 1e-24  ;;  %v74_v43 = vpop.permute.xlu1 %73 }
  0xad   :  { %v83_v44 = vsub.f32 %v74_v43, %v3016_v42 }
  0xae   :  { %3282 = vrsqrt.f32 %v51_v17 }
  0xaf   :  { %v3663_v45 = vand.u32 2147483647, %v83_v44 }
  0xb1   :  { %v3017_v46 = vadd.f32 -1.0, %v3663_v45  ;;  %3284 = vtanh.f32 %v3663_v45  ;;  %vm85_vm2 = vcmp.le.f32.partialorder %v3663_v45, 0.5 }
  0xb3   :  { %3286 = vtanh.f32 %v3017_v46 }
  0xb7   :  { %v3279_v18 = vpop.eup %3278 }
  0xb8   :  { %v3281_v19 = vpop.eup %3280  ;;  %v61_v20 = vmul.f32 %v3279_v18, %v54_v0 }
  0xb9   :  { %v69_v21 = vmul.f32 %v3281_v19, %v62_v2 }
  0xba   :  { %v99_v22 = vsel %vm47_vm0, %v61_v20, 0 }
  0xbb   :  { %v3283_v23 = vpop.eup %3282  ;;  %v3451_v24 = vand.u32 4294901760, %v99_v22  ;;  %v572_v25 = vsel %vm47_vm0, %v69_v21, 0 }
  0xbc   :  { %v53_v26 = vmul.f32 %v3283_v23, %v45_v1  ;;  %v3457_v28 = vand.u32 4294901760, %v572_v25 }
  0xbd   :  { %v3455_v27 = vsub.f32 %v99_v22, %v3451_v24  ;;  %3091 = vmatpush3.xpose.msra.mxu0 %v3451_v24 }
  0xbe   :  { %v96_v29 = vsel %vm47_vm0, %v53_v26, 0  ;;  %3100 = vmatprep.subr.mxu0 %v3392_v9  ;;  %v3471_v33 = vsub.f32 %v572_v25, %v3457_v28  ;;  %v3285_v47 = vpop.eup %3284 }
  0xbf   :  { %v3462_v30 = vand.u32 4294901760, %v96_v29  ;;  %v3465_v31 = vand.u32 4294901760, %v3455_v27  ;;  %v91_v50 = vmul.f32 1.5, %v3285_v47 }
  0xc0   :  { %v3484_v38 = vand.u32 4294901760, %v3471_v33  ;;  %v3287_v48 = vpop.eup %3286 }
  0xc1   :  { %v3468_v32 = vsub.f32 %v96_v29, %v3462_v30  ;;  %v211_v34 = vsub.f32 %v3455_v27, %v3465_v31  ;;  %v88_v49 = vsub.f32 0.0, %v3287_v48  ;;  %v92_v55 = vmul.f32 0.8, %v91_v50 }
  0xc2   :  { %v684_v40 = vsub.f32 %v3471_v33, %v3484_v38 }
  0xc3   :  { %v3475_v35 = vand.u32 4294901760, %v211_v34  ;;  %v3478_v36 = vand.u32 4294901760, %v3468_v32  ;;  %v89_v54 = vmul.f32 1.5, %v88_v49 }
  0xc4   :  { %v3504_v41 = vand.u32 4294901760, %v684_v40 }
  0xc5   :  { %3096 = vmatpush3.xpose.msra.mxu1 %v3475_v35  ;;  %v170_v37 = vsub.f32 %v3468_v32, %v3478_v36  ;;  %v93_v62 = vsel %vm85_vm2, %v89_v54, %v92_v55 }
  0xc6   :  { %3105 = vmatprep.subr.mxu1 %v3392_v9  ;;  %v3670_v3 = vmul.f32 33.333332, %v93_v62 }
  0xc7   :  { %v3487_v39 = vand.u32 4294901760, %v170_v37 }
  0xc8   :  { %3098 = vmatmul.mubr.f32.vlgmr.msra.gmra.mxu1 %v3462_v30 }
  0xc9   :  { %3093 = vmatmul.mubr.f32.vlgmr.msra.gmra.mxu0 %v3487_v39  ;;  %3106 = vmatpush3.xpose.msra.mxu1 %v3451_v24 }
  0xca   :  { %3101 = vmatpush3.xpose.msra.mxu0 %v3455_v27  ;;  %3107 = vmatprep.mubr.msk.f32.mxu1 %vm3393_vm1, %v3392_v9 }
  0xcb   :  { %3102 = vmatprep.mubr.msk.f32.mxu0 %vm3393_vm1, %v3392_v9  ;;  %3110 = vmatprep.subr.mxu0 %v3392_v9 }
  0xcc   :  { %3108 = vmatmul.mubr.f32.vlgmr.msra.gmra.mxu1 %v3478_v36  ;;  %3115 = vmatprep.subr.mxu1 %v3392_v9 }
  0xcd   :  { %3103 = vmatmul.mubr.f32.vlgmr.msra.gmra.mxu0 %v3468_v32  ;;  %3116 = vmatpush3.xpose.msra.mxu1 %v3451_v24 }
  0xce   :  { %3111 = vmatpush3.xpose.msra.mxu0 %v3465_v31  ;;  %3117 = vmatprep.mubr.msk.f32.mxu1 %vm3393_vm1, %v3392_v9 }
  0xcf   :  { %3112 = vmatprep.mubr.msk.f32.mxu0 %vm3393_vm1, %v3392_v9  ;;  %3120 = vmatprep.subr.mxu0 %v3392_v9 }
  0xd0   :  { %3118 = vmatmul.mubr.f32.vlgmr.msra.gmra.mxu1 %v3462_v30  ;;  %3125 = vmatprep.subr.mxu1 %v3392_v9 }
  0xd1   :  { %3113 = vmatmul.mubr.f32.vlgmr.msra.gmra.mxu0 %v3462_v30  ;;  %3126 = vmatpush3.xpose.msra.mxu1 %v3504_v41 }
  0xd2   :  { %3121 = vmatpush3.xpose.msra.mxu0 %v3457_v28  ;;  %3127 = vmatprep.mubr.msk.f32.mxu1 %vm3393_vm1, %v3392_v9 }
  0xd3   :  { %3122 = vmatprep.mubr.msk.f32.mxu0 %vm3393_vm1, %v3392_v9  ;;  %3130 = vmatprep.subr.mxu0 %v3392_v9 }
  0xd4   :  { %3128 = vmatmul.mubr.f32.vlgmr.msra.gmra.mxu1 %v3462_v30  ;;  %3135 = vmatprep.subr.mxu1 %v3392_v9 }
  0xd5   :  { %3123 = vmatmul.mubr.f32.vlgmr.msra.gmra.mxu0 %v3487_v39  ;;  %3136 = vmatpush3.xpose.msra.mxu1 %v3457_v28 }
  0xd6   :  { %3131 = vmatpush3.xpose.msra.mxu0 %v3471_v33  ;;  %3137 = vmatprep.mubr.msk.f32.mxu1 %vm3393_vm1, %v3392_v9 }
  0xd7   :  { %3132 = vmatprep.mubr.msk.f32.mxu0 %vm3393_vm1, %v3392_v9  ;;  %3140 = vmatprep.subr.mxu0 %v3392_v9 }
  0xd8   :  { %3138 = vmatmul.mubr.f32.vlgmr.msra.gmra.mxu1 %v3478_v36  ;;  %3145 = vmatprep.subr.mxu1 %v3392_v9 }
  0xd9   :  { %3133 = vmatmul.mubr.f32.vlgmr.msra.gmra.mxu0 %v3468_v32  ;;  %3146 = vmatpush3.xpose.msra.mxu1 %v3457_v28 }
  0xda   :  { %3141 = vmatpush3.xpose.msra.mxu0 %v3484_v38  ;;  %3147 = vmatprep.mubr.msk.f32.mxu1 %vm3393_vm1, %v3392_v9 }
  0xdb   :  { %3142 = vmatprep.mubr.msk.f32.mxu0 %vm3393_vm1, %v3392_v9  ;;  %3150 = vmatprep.subr.mxu0 %v3392_v9 }
  0xdc   :  { %3148 = vmatmul.mubr.f32.vlgmr.msra.gmra.mxu1 %v3462_v30  ;;  %3155 = vmatprep.subr.mxu1 %v3392_v9 }
  0xdd   :  { %3143 = vmatmul.mubr.f32.vlgmr.msra.gmra.mxu0 %v3462_v30  ;;  %3156 = vmatpush3.xpose.msra.mxu1 %v3475_v35 }
  0xde   :  { %3151 = vmatpush3.xpose.msra.mxu0 %v3451_v24  ;;  %3157 = vmatprep.mubr.msk.f32.mxu1 %vm3393_vm1, %v3392_v9 }
  0xdf   :  { %3152 = vmatprep.mubr.msk.f32.mxu0 %vm3393_vm1, %v3392_v9  ;;  %3160 = vmatprep.subr.mxu0 %v3392_v9 }
  0xe0   :  { %3158 = vmatmul.mubr.f32.vlgmr.msra.gmra.mxu1 %v3457_v28  ;;  %3165 = vmatprep.subr.mxu1 %v3392_v9 }
  0xe1   :  { %3153 = vmatmul.mubr.f32.vlgmr.msra.gmra.mxu0 %v3504_v41  ;;  %3166 = vmatpush3.xpose.msra.mxu1 %v3451_v24 }
  0xe2   :  { %3161 = vmatpush3.xpose.msra.mxu0 %v3455_v27  ;;  %3167 = vmatprep.mubr.msk.f32.mxu1 %vm3393_vm1, %v3392_v9 }
  0xe3   :  { %3162 = vmatprep.mubr.msk.f32.mxu0 %vm3393_vm1, %v3392_v9  ;;  %3170 = vmatprep.subr.mxu0 %v3392_v9 }
  0xe4   :  { %3168 = vmatmul.mubr.f32.vlgmr.msra.gmra.mxu1 %v3484_v38  ;;  %3175 = vmatprep.subr.mxu1 %v3392_v9 }
  0xe5   :  { %3163 = vmatmul.mubr.f32.vlgmr.msra.gmra.mxu0 %v3471_v33  ;;  %3176 = vmatpush3.xpose.msra.mxu1 %v3451_v24 }
  0xe6   :  { %3171 = vmatpush3.xpose.msra.mxu0 %v3465_v31  ;;  %3177 = vmatprep.mubr.msk.f32.mxu1 %vm3393_vm1, %v3392_v9 }
  0xe7   :  { %3172 = vmatprep.mubr.msk.f32.mxu0 %vm3393_vm1, %v3392_v9  ;;  %3180 = vmatprep.subr.mxu0 %v3392_v9 }
  0xe8   :  { %3178 = vmatmul.mubr.f32.vlgmr.msra.gmra.mxu1 %v3457_v28  ;;  %3185 = vmatprep.subr.mxu1 %v3392_v9 }
  0xe9   :  { %3173 = vmatmul.mubr.f32.vlgmr.msra.gmra.mxu0 %v3457_v28  ;;  %3186 = vmatpush3.xpose.msra.mxu1 %v3487_v39 }
  0xea   :  { %3181 = vmatpush3.xpose.msra.mxu0 %v3462_v30  ;;  %3187 = vmatprep.mubr.msk.f32.mxu1 %vm3393_vm1, %v3392_v9 }
  0xeb   :  { %3182 = vmatprep.mubr.msk.f32.mxu0 %vm3393_vm1, %v3392_v9  ;;  %3190 = vmatprep.subr.mxu0 %v3392_v9 }
  0xec   :  { %3188 = vmatmul.mubr.f32.vlgmr.msra.gmra.mxu1 %v3462_v30  ;;  %3195 = vmatprep.subr.mxu1 %v3392_v9 }
  0xed   :  { %3183 = vmatmul.mubr.f32.vlgmr.msra.gmra.mxu0 %v3487_v39  ;;  %3196 = vmatpush3.xpose.msra.mxu1 %v3462_v30 }
  0xee   :  { %3191 = vmatpush3.xpose.msra.mxu0 %v3468_v32  ;;  %3197 = vmatprep.mubr.msk.f32.mxu1 %vm3393_vm1, %v3392_v9 }
  0xef   :  { %3192 = vmatprep.mubr.msk.f32.mxu0 %vm3393_vm1, %v3392_v9  ;;  %3200 = vmatprep.subr.mxu0 %v3392_v9 }
  0xf0   :  { %3198 = vmatmul.mubr.f32.vlgmr.msra.gmra.mxu1 %v3478_v36  ;;  %3205 = vmatprep.subr.mxu1 %v3392_v9 }
  0xf1   :  { %3193 = vmatmul.mubr.f32.vlgmr.msra.gmra.mxu0 %v3468_v32  ;;  %3206 = vmatpush3.xpose.msra.mxu1 %v3462_v30 }
  0xf2   :  { %3201 = vmatpush3.xpose.msra.mxu0 %v3478_v36  ;;  %3207 = vmatprep.mubr.msk.f32.mxu1 %vm3393_vm1, %v3392_v9 }
  0xf3   :  { %3202 = vmatprep.mubr.msk.f32.mxu0 %vm3393_vm1, %v3392_v9  ;;  %3210 = vmatprep.subr.mxu0 %v3392_v9 }
  0xf4   :  { %3208 = vmatmul.mubr.f32.vlgmr.msra.gmra.mxu1 %v3462_v30  ;;  %3215 = vmatprep.subr.mxu1 %v3392_v9 }
  0xf5   :  { %3203 = vmatmul.mubr.f32.vlgmr.msra.gmra.mxu0 %v3462_v30  ;;  %3216 = vmatpush3.xpose.msra.mxu1 %v3475_v35 }
  0xf6   :  { %3211 = vmatpush3.xpose.msra.mxu0 %v3451_v24  ;;  %3217 = vmatprep.mubr.msk.f32.mxu1 %vm3393_vm1, %v3392_v9 }
  0xf7   :  { %3212 = vmatprep.mubr.msk.f32.mxu0 %vm3393_vm1, %v3392_v9  ;;  %3220 = vmatprep.subr.mxu0 %v3392_v9 }
  0xf8   :  { %3218 = vmatmul.mubr.f32.vlgmr.msra.gmra.mxu1 %v3451_v24  ;;  %3225 = vmatprep.subr.mxu1 %v3392_v9 }
  0xf9   :  { %3213 = vmatmul.mubr.f32.vlgmr.msra.gmra.mxu0 %v3475_v35  ;;  %3226 = vmatpush3.xpose.msra.mxu1 %v3451_v24 }
  0xfa   :  { %3221 = vmatpush3.xpose.msra.mxu0 %v3455_v27  ;;  %3227 = vmatprep.mubr.msk.f32.mxu1 %vm3393_vm1, %v3392_v9 }
  0xfb   :  { %3222 = vmatprep.mubr.msk.f32.mxu0 %vm3393_vm1, %v3392_v9  ;;  %3230 = vmatprep.subr.mxu0 %v3392_v9 }
  0xfc   :  { %3228 = vmatmul.mubr.f32.vlgmr.msra.gmra.mxu1 %v3465_v31  ;;  %3235 = vmatprep.subr.mxu1 %v3392_v9 }
  0xfd   :  { %3223 = vmatmul.mubr.f32.vlgmr.msra.gmra.mxu0 %v3455_v27  ;;  %3236 = vmatpush3.xpose.msra.mxu1 %v3451_v24 }
  0xfe   :  { %3231 = vmatpush3.xpose.msra.mxu0 %v3465_v31  ;;  %3237 = vmatprep.mubr.msk.f32.mxu1 %vm3393_vm1, %v3392_v9 }
  0xff   :  { %3232 = vmatprep.mubr.msk.f32.mxu0 %vm3393_vm1, %v3392_v9  ;;  %3240 = vmatprep.subr.mxu0 %v3392_v9 }
 0x100   :  { %3238 = vmatmul.mubr.f32.vlgmr.msra.gmra.mxu1 %v3451_v24  ;;  %3245 = vmatprep.subr.mxu1 %v3392_v9 }
 0x101   :  { %3233 = vmatmul.mubr.f32.vlgmr.msra.gmra.mxu0 %v3451_v24  ;;  %3246 = vmatpush3.xpose.msra.mxu1 %v3504_v41 }
 0x102   :  { %3241 = vmatpush3.xpose.msra.mxu0 %v3457_v28  ;;  %3247 = vmatprep.mubr.msk.f32.mxu1 %vm3393_vm1, %v3392_v9 }
 0x103   :  { %3242 = vmatprep.mubr.msk.f32.mxu0 %vm3393_vm1, %v3392_v9  ;;  %3250 = vmatprep.subr.mxu0 %v3392_v9 }
 0x104   :  { %3248 = vmatmul.mubr.f32.vlgmr.msra.gmra.mxu1 %v3457_v28  ;;  %3255 = vmatprep.subr.mxu1 %v3392_v9 }
 0x105   :  { %3243 = vmatmul.mubr.f32.vlgmr.msra.gmra.mxu0 %v3504_v41  ;;  %3256 = vmatpush3.xpose.msra.mxu1 %v3457_v28 }
 0x106   :  { %3251 = vmatpush3.xpose.msra.mxu0 %v3471_v33  ;;  %3257 = vmatprep.mubr.msk.f32.mxu1 %vm3393_vm1, %v3392_v9 }
 0x107   :  { %3252 = vmatprep.mubr.msk.f32.mxu0 %vm3393_vm1, %v3392_v9  ;;  %3260 = vmatprep.subr.mxu0 %v3392_v9 }
 0x108   :  { %3258 = vmatmul.mubr.f32.vlgmr.msra.gmra.mxu1 %v3484_v38  ;;  %3265 = vmatprep.subr.mxu1 %v3392_v9 }
 0x109   :  { %3253 = vmatmul.mubr.f32.vlgmr.msra.gmra.mxu0 %v3471_v33  ;;  %3266 = vmatpush3.xpose.msra.mxu1 %v3457_v28 }
 0x10a   :  { %3261 = vmatpush3.xpose.msra.mxu0 %v3484_v38  ;;  %3267 = vmatprep.mubr.msk.f32.mxu1 %vm3393_vm1, %v3392_v9 }
 0x10b   :  { %3262 = vmatprep.mubr.msk.f32.mxu0 %vm3393_vm1, %v3392_v9 }
 0x10c   :  { %3268 = vmatmul.mubr.f32.vlgmr.msra.gmra.mxu1 %v3457_v28 }
 0x10d   :  { %3263 = vmatmul.mubr.f32.vlgmr.msra.gmra.mxu0 %v3457_v28 }
 0x188   :  { %v249_v51 = vpop.f32.mrf.mxu1 }
 0x189   :  { %v173_v52 = vpop.f32.mrf.mxu0 }
 0x18a   :  { %v3099_v53 = vpop.f32.mrf.mxu1  ;;  %v250_v57 = vadd.f32 %v249_v51, %v173_v52 }
 0x18b   :  { %v3094_v56 = vpop.f32.mrf.mxu0 }
 0x18c   :  { %v397_v58 = vpop.f32.mrf.mxu1 }
 0x18d   :  { %v323_v59 = vpop.f32.mrf.mxu0 }
 0x18e   :  { %v324_v60 = vadd.f32 %v323_v59, %v250_v57  ;;  %v3109_v61 = vpop.f32.mrf.mxu1 }
 0x18f   :  { %v3104_v63 = vpop.f32.mrf.mxu0 }
 0x190   :  { %v543_v0 = vpop.f32.mrf.mxu1  ;;  %v398_v1 = vadd.f32 %v397_v58, %v324_v60 }
 0x191   :  { %v471_v2 = vpop.f32.mrf.mxu0 }
 0x192   :  { %v472_v4 = vadd.f32 %v471_v2, %v398_v1  ;;  %v3119_v5 = vpop.f32.mrf.mxu1 }
 0x193   :  { %v3114_v6 = vpop.f32.mrf.mxu0 }
 0x194   :  { %v544_v7 = vadd.f32 %v543_v0, %v472_v4  ;;  %v722_v8 = vpop.f32.mrf.mxu1 }
 0x195   :  { %v646_v9 = vpop.f32.mrf.mxu0 }
 0x196   :  { %v547_v10 = vmul.f32 %v544_v7, %v3670_v3  ;;  %v3129_v11 = vpop.f32.mrf.mxu1  ;;  %v723_v14 = vadd.f32 %v722_v8, %v646_v9 }
 0x197   :  { %v3124_v12 = vpop.f32.mrf.mxu0 }
 0x198   :  { %v548_v13 = vmul.f32 1.442695, %v547_v10  ;;  %v870_v15 = vpop.f32.mrf.mxu1 }
 0x199   :  { %v796_v16 = vpop.f32.mrf.mxu0 }
 0x19a   :  { %3288 = vpow2.f32 %v548_v13  ;;  %v797_v17 = vadd.f32 %v796_v16, %v723_v14  ;;  %v3139_v18 = vpop.f32.mrf.mxu1 }
 0x19b   :  { %v3134_v19 = vpop.f32.mrf.mxu0 }
 0x19c   :  { %v1016_v20 = vpop.f32.mrf.mxu1  ;;  %v871_v21 = vadd.f32 %v870_v15, %v797_v17 }
 0x19d   :  { %v944_v22 = vpop.f32.mrf.mxu0 }
 0x19e   :  { %v945_v23 = vadd.f32 %v944_v22, %v871_v21  ;;  %v3149_v24 = vpop.f32.mrf.mxu1 }
 0x19f   :  { %v3144_v25 = vpop.f32.mrf.mxu0 }
 0x1a0   :  { %v1017_v26 = vadd.f32 %v1016_v20, %v945_v23  ;;  %v1191_v27 = vpop.f32.mrf.mxu1 }
 0x1a1   :  { %v1115_v28 = vpop.f32.mrf.mxu0 }
 0x1a2   :  { %v1020_v29 = vmul.f32 %v1017_v26, %v3670_v3  ;;  %v3159_v30 = vpop.f32.mrf.mxu1  ;;  %v1192_v33 = vadd.f32 %v1191_v27, %v1115_v28 }
 0x1a3   :  { %v3154_v31 = vpop.f32.mrf.mxu0 }
 0x1a4   :  { %v1021_v32 = vmul.f32 1.442695, %v1020_v29  ;;  %v1339_v34 = vpop.f32.mrf.mxu1 }
 0x1a5   :  { %v1265_v35 = vpop.f32.mrf.mxu0 }
 0x1a6   :  { %3290 = vpow2.f32 %v1021_v32  ;;  %v1266_v36 = vadd.f32 %v1265_v35, %v1192_v33  ;;  %v3169_v37 = vpop.f32.mrf.mxu1 }
 0x1a7   :  { %v3289_v38 = vpop.eup %3288  ;;  %v3164_v39 = vpop.f32.mrf.mxu0 }
 0x1a8   :  { %v1485_v40 = vpop.f32.mrf.mxu1  ;;  %v1340_v41 = vadd.f32 %v1339_v34, %v1266_v36  ;;  %v550_v42 = vsel %vm85_vm2, %v3289_v38, 1.0  ;;  %v551_v48 = vsel %vm85_vm2, 1.0, %v3289_v38 }
 0x1a9   :  { %v1413_v43 = vpop.f32.mrf.mxu0  ;;  %v3677_v44 = vsel %vm552_vm3, %v550_v42, 0.0  ;;  %v3683_v53 = vsel %vm552_vm3, %v551_v48, 0.0 }
 0x1aa   :  { %v1414_v46 = vadd.f32 %v1413_v43, %v1340_v41  ;;  %v3179_v47 = vpop.f32.mrf.mxu1  ;;  %554 = vadd.xlane.f32.xlu0 %v3677_v44 }
 0x1ab   :  { %v3174_v49 = vpop.f32.mrf.mxu0 }
 0x1ac   :  { %v1486_v50 = vadd.f32 %v1485_v40, %v1414_v46  ;;  %v1660_v51 = vpop.f32.mrf.mxu1 }
 0x1ad   :  { %v1584_v52 = vpop.f32.mrf.mxu0 }
 0x1ae   :  { %v1489_v54 = vmul.f32 %v1486_v50, %v3670_v3  ;;  %v3189_v55 = vpop.f32.mrf.mxu1  ;;  %557 = vadd.xlane.f32.xlu0 %v3683_v53  ;;  %v1661_v58 = vadd.f32 %v1660_v51, %v1584_v52 }
 0x1af   :  { %v3184_v56 = vpop.f32.mrf.mxu0 }
 0x1b0   :  { %v1490_v57 = vmul.f32 1.442695, %v1489_v54  ;;  %v1808_v59 = vpop.f32.mrf.mxu1 }
 0x1b1   :  { %v1734_v60 = vpop.f32.mrf.mxu0 }
 0x1b2   :  { %3292 = vpow2.f32 %v1490_v57  ;;  %v1735_v61 = vadd.f32 %v1734_v60, %v1661_v58  ;;  %v3199_v62 = vpop.f32.mrf.mxu1 }
 0x1b3   :  { %v3291_v63 = vpop.eup %3290  ;;  %v3194_v0 = vpop.f32.mrf.mxu0 }
 0x1b4   :  { %v1954_v1 = vpop.f32.mrf.mxu1  ;;  %v1809_v2 = vadd.f32 %v1808_v59, %v1735_v61  ;;  %v1024_v4 = vsel %vm85_vm2, 1.0, %v3291_v63  ;;  %v1023_v7 = vsel %vm85_vm2, %v3291_v63, 1.0  ;;  %v559_v61 = vrot.slane %v3677_v44, 4 }
 0x1b5   :  { %v1882_v5 = vpop.f32.mrf.mxu0  ;;  %v3690_v6 = vsel %vm552_vm3, %v1024_v4, 0.0  ;;  %v3696_v10 = vsel %vm552_vm3, %v1023_v7, 0.0 }
 0x1b6   :  { %v1883_v8 = vadd.f32 %v1882_v5, %v1809_v2  ;;  %v3209_v9 = vpop.f32.mrf.mxu1  ;;  %1029 = vadd.xlane.f32.xlu1 %v3690_v6  ;;  %1026 = vadd.xlane.f32.xlu0 %v3696_v10  ;;  %v560_v5 = vadd.f32 %v559_v61, %v3677_v44 }
 0x1b7   :  { %v3204_v11 = vpop.f32.mrf.mxu0 }
 0x1b8   :  { %v1955_v12 = vadd.f32 %v1954_v1, %v1883_v8  ;;  %v2117_v13 = vpop.f32.mrf.mxu1  ;;  %v565_v1 = vrot.slane %v3683_v53, 4 }
 0x1b9   :  { %v2041_v14 = vpop.f32.mrf.mxu0 }
 0x1ba   :  { %v1958_v15 = vmul.f32 %v1955_v12, %v3670_v3  ;;  %v3219_v16 = vpop.f32.mrf.mxu1  ;;  %v2118_v19 = vadd.f32 %v2117_v13, %v2041_v14  ;;  %v566_v11 = vadd.f32 %v565_v1, %v3683_v53  ;;  %v561_v13 = vrot.slane %v560_v5, 2 }
 0x1bb   :  { %v3214_v17 = vpop.f32.mrf.mxu0  ;;  %v1031_v53 = vrot.slane %v3696_v10, 4 }
 0x1bc   :  { %v1959_v18 = vmul.f32 1.442695, %v1958_v15  ;;  %v2265_v20 = vpop.f32.mrf.mxu1 }
 0x1bd   :  { %v2191_v21 = vpop.f32.mrf.mxu0 }
 0x1be   :  { %3294 = vpow2.f32 %v1959_v18  ;;  %v2192_v22 = vadd.f32 %v2191_v21, %v2118_v19  ;;  %v3229_v23 = vpop.f32.mrf.mxu1  ;;  %v562_v21 = vadd.f32 %v561_v13, %v560_v5 }
 0x1bf   :  { %v3293_v24 = vpop.eup %3292  ;;  %v3224_v25 = vpop.f32.mrf.mxu0 }
 0x1c0   :  { %v2411_v26 = vpop.f32.mrf.mxu1  ;;  %v2266_v27 = vadd.f32 %v2265_v20, %v2192_v22  ;;  %v1492_v28 = vsel %vm85_vm2, %v3293_v24, 1.0  ;;  %v1493_v33 = vsel %vm85_vm2, 1.0, %v3293_v24 }
 0x1c1   :  { %v2339_v29 = vpop.f32.mrf.mxu0  ;;  %v1494_v30 = vsel %vm552_vm3, %v1492_v28, 0.0  ;;  %v1497_v38 = vsel %vm552_vm3, %v1493_v33, 0.0 }
 0x1c2   :  { %v2340_v31 = vadd.f32 %v2339_v29, %v2266_v27  ;;  %v3239_v32 = vpop.f32.mrf.mxu1  ;;  %1495 = vadd.xlane.f32.xlu0 %v1494_v30  ;;  %v1500_v62 = vrot.slane %v1494_v30, 4  ;;  %v1506_v8 = vrot.slane %v1497_v38, 4  ;;  %v1037_v27 = vrot.slane %v3690_v6, 4 }
 0x1c3   :  { %v3234_v34 = vpop.f32.mrf.mxu0 }
 0x1c4   :  { %v2412_v35 = vadd.f32 %v2411_v26, %v2340_v31  ;;  %v2582_v36 = vpop.f32.mrf.mxu1  ;;  %v1501_v7 = vadd.f32 %v1500_v62, %v1494_v30  ;;  %v1507_v15 = vadd.f32 %v1506_v8, %v1497_v38  ;;  %v563_v30 = vrot.slane %v562_v21, 1 }
 0x1c5   :  { %v2506_v37 = vpop.f32.mrf.mxu0  ;;  %v1032_v31 = vadd.f32 %v1031_v53, %v3696_v10 }
 0x1c6   :  { %v2415_v39 = vmul.f32 %v2412_v35, %v3670_v3  ;;  %v3249_v40 = vpop.f32.mrf.mxu1  ;;  %1498 = vadd.xlane.f32.xlu0 %v1497_v38  ;;  %v2583_v43 = vadd.f32 %v2582_v36, %v2506_v37  ;;  %v1502_v14 = vrot.slane %v1501_v7, 2  ;;  %v1508_v23 = vrot.slane %v1507_v15, 2 }
 0x1c7   :  { %v3244_v41 = vpop.f32.mrf.mxu0  ;;  %v1038_v37 = vadd.f32 %v1037_v27, %v3690_v6  ;;  %v564_v40 = vadd.f32 %v563_v30, %v562_v21 }
 0x1c8   :  { %v2416_v42 = vmul.f32 1.442695, %v2415_v39  ;;  %v2730_v46 = vpop.f32.mrf.mxu1  ;;  %v1503_v22 = vadd.f32 %v1502_v14, %v1501_v7  ;;  %v1509_v33 = vadd.f32 %v1508_v23, %v1507_v15  ;;  %v1033_v41 = vrot.slane %v1032_v31, 2 }
 0x1c9   :  { %v2656_v47 = vpop.f32.mrf.mxu0 }
 0x1ca   :  { %3296 = vpow2.f32 %v2416_v42  ;;  %v2657_v48 = vadd.f32 %v2656_v47, %v2583_v43  ;;  %v3259_v49 = vpop.f32.mrf.mxu1  ;;  %v1504_v32 = vrot.slane %v1503_v22, 1  ;;  %v1510_v43 = vrot.slane %v1509_v33, 1 }
 0x1cb   :  { %v3295_v50 = vpop.eup %3294  ;;  %v3254_v51 = vpop.f32.mrf.mxu0 }
 0x1cc   :  { %v2876_v52 = vpop.f32.mrf.mxu1  ;;  %v2731_v54 = vadd.f32 %v2730_v46, %v2657_v48  ;;  %v1961_v55 = vsel %vm85_vm2, %v3295_v50, 1.0  ;;  %v1962_v60 = vsel %vm85_vm2, 1.0, %v3295_v50  ;;  %v1505_v42 = vadd.f32 %v1504_v32, %v1503_v22 }
 0x1cd   :  { %v2804_v56 = vpop.f32.mrf.mxu0  ;;  %v1963_v57 = vsel %vm552_vm3, %v1961_v55, 0.0  ;;  %v1966_v2 = vsel %vm552_vm3, %v1962_v60, 0.0  ;;  %v1039_v50 = vrot.slane %v1038_v37, 2 }
 0x1ce   :  { %v2805_v58 = vadd.f32 %v2804_v56, %v2731_v54  ;;  %v3269_v59 = vpop.f32.mrf.mxu1  ;;  %1964 = vadd.xlane.f32.xlu0 %v1963_v57  ;;  %v1034_v57 = vadd.f32 %v1033_v41, %v1032_v31 }
 0x1cf   :  { %v3264_v63 = vpop.f32.mrf.mxu0  ;;  %v1040_v62 = vadd.f32 %v1039_v50, %v1038_v37 }
 0x1d0   :  { %v2877_v0 = vadd.f32 %v2876_v52, %v2805_v58  ;;  %v1511_v58 = vadd.f32 %v1510_v43, %v1509_v33 }
 0x1d1   :  { %v1041_v8 = vrot.slane %v1040_v62, 1 }
 0x1d2   :  { %v2880_v4 = vmul.f32 %v2877_v0, %v3670_v3  ;;  %1967 = vadd.xlane.f32.xlu0 %v1966_v2  ;;  %v567_v3 = vrot.slane %v566_v11, 2 }
 0x1d3   :  { %v1042_v15 = vadd.f32 %v1041_v8, %v1040_v62 }
 0x1d4   :  { %v2881_v9 = vmul.f32 1.442695, %v2880_v4  ;;  %v568_v26 = vadd.f32 %v567_v3, %v566_v11  ;;  %v1035_v4 = vrot.slane %v1034_v57, 1 }
 0x1d6   :  { %3298 = vpow2.f32 %v2881_v9  ;;  %v569_v36 = vrot.slane %v568_v26, 1 }
 0x1d7   :  { %v3297_v12 = vpop.eup %3296 }
 0x1d8   :  { %v2419_v16 = vsel %vm85_vm2, 1.0, %v3297_v12  ;;  %v2418_v17 = vsel %vm85_vm2, %v3297_v12, 1.0  ;;  %v570_v49 = vadd.f32 %v569_v36, %v568_v26  ;;  %v1036_v12 = vadd.f32 %v1035_v4, %v1034_v57 }
 0x1d9   :  { %v2420_v18 = vsel %vm552_vm3, %v2418_v17, 0.0  ;;  %v2427_v44 = vsel %vm552_vm3, %v2419_v16, 0.0 }
 0x1da   :  { %v2421_v19 = vrot.slane %v2420_v18, 4  ;;  %v2428_v20 = vrot.slane %v2427_v44, 4 }
 0x1dc   :  { %v2422_v24 = vadd.f32 %v2421_v19, %v2420_v18  ;;  %v2429_v25 = vadd.f32 %v2428_v20, %v2427_v44 }
 0x1de   :  { %v2423_v28 = vrot.slane %v2422_v24, 2  ;;  %v2430_v29 = vrot.slane %v2429_v25, 2 }
 0x1e0   :  { %v2424_v34 = vadd.f32 %v2423_v28, %v2422_v24  ;;  %v2431_v35 = vadd.f32 %v2430_v29, %v2429_v25 }
 0x1e2   :  { %v2425_v38 = vrot.slane %v2424_v34, 1  ;;  %v2432_v48 = vrot.slane %v2431_v35, 1 }
 0x1e3   :  { %v3299_v39 = vpop.eup %3298 }
 0x1e4   :  { %v2883_v46 = vsel %vm85_vm2, %v3299_v39, 1.0  ;;  %v2884_v47 = vsel %vm85_vm2, 1.0, %v3299_v39  ;;  %v2426_v10 = vadd.f32 %v2425_v38, %v2424_v34  ;;  %v2433_v61 = vadd.f32 %v2432_v48, %v2431_v35 }
 0x1e5   :  { %v2885_v51 = vsel %vm552_vm3, %v2883_v46, 0.0  ;;  %v2888_v6 = vsel %vm552_vm3, %v2884_v47, 0.0 }
 0x1e6   :  { %2886 = vadd.xlane.f32.xlu0 %v2885_v51  ;;  %v2891_v52 = vrot.slane %v2885_v51, 4  ;;  %v2897_v54 = vrot.slane %v2888_v6, 4  ;;  %v2919_v55 = vadd.f32 %v2426_v10, %v564_v40  ;;  %v2981_v56 = vadd.f32 %v2426_v10, %v1505_v42 }
 0x1e8   :  { %v2892_v59 = vadd.f32 %v2891_v52, %v2885_v51  ;;  %v2898_v60 = vadd.f32 %v2897_v54, %v2888_v6  ;;  %v2920_v45 = vadd.f32 %v2919_v55, %v570_v49  ;;  %v2982_v2 = vadd.f32 %v2981_v56, %v1511_v58 }
 0x1ea   :  { %v2893_v63 = vrot.slane %v2892_v59, 2  ;;  %v2899_v0 = vrot.slane %v2898_v60, 2  ;;  %2889 = vadd.xlane.f32.xlu0 %v2888_v6  ;;  %v2921_v1 = vadd.f32 %v2920_v45, %v2433_v61  ;;  %v2983_v11 = vadd.f32 %v2982_v2, %v2433_v61 }
 0x1ec   :  { %v2894_v5 = vadd.f32 %v2893_v63, %v2892_v59  ;;  %v2900_v7 = vadd.f32 %v2899_v0, %v2898_v60  ;;  %3300 = vrcp.f32 %v2921_v1 }
 0x1ed   :  { %3302 = vrcp.f32 %v2983_v11 }
 0x1ee   :  { %v2895_v9 = vrot.slane %v2894_v5, 1  ;;  %v2901_v14 = vrot.slane %v2900_v7, 1 }
 0x1f0   :  { %v2896_v13 = vadd.f32 %v2895_v9, %v2894_v5  ;;  %v2902_v17 = vadd.f32 %v2901_v14, %v2900_v7 }
 0x1f2   :  { %v2950_v16 = vadd.f32 %v2896_v13, %v1036_v12 }
 0x1f4   :  { %v2951_v3 = vadd.f32 %v2950_v16, %v1042_v15 }
 0x1f6   :  { %v2952_v18 = vadd.f32 %v2951_v3, %v2902_v17 }
 0x1f8   :  { %3304 = vrcp.f32 %v2952_v18 }
 0x1f9   :  { %v3301_v44 = vpop.eup %3300 }
 0x1fa   :  { %v2923_v19 = vmul.f32 %v3301_v44, %v2919_v55  ;;  %v3303_v20 = vpop.eup %3302 }
 0x1fb   :  { %v2985_v21 = vmul.f32 %v3303_v20, %v2981_v56 }
 0x1fc   :  { %3306 = vlog2.f32 %v2923_v19 }
 0x1fd   :  { %3308 = vlog2.f32 %v2985_v21 }
 0x205   :  { %v3305_v53 = vpop.eup %3304 }
 0x206   :  { %v2954_v22 = vmul.f32 %v3305_v53, %v2950_v16 }
 0x208   :  { %3310 = vlog2.f32 %v2954_v22 }
 0x209   :  { %v3307_v23 = vpop.eup %3306 }
 0x20a   :  { %v2925_v24 = vmul.f32 0.6931472, %v3307_v23  ;;  %v3309_v27 = vpop.eup %3308 }
 0x20b   :  { %v2987_v30 = vmul.f32 0.6931472, %v3309_v27 }
 0x20c   :  { %v2926_v25 = vsub.f32 0.0, %v2925_v24 }
 0x20d   :  { %v2988_v33 = vsub.f32 0.0, %v2987_v30 }
 0x20e   :  { %v2927_v26 = vsel %vm552_vm3, %v2926_v25, 0.0 }
 0x20f   :  { %2928 = vadd.xlane.f32.xlu0 %v2927_v26  ;;  %v2989_v34 = vsel %vm552_vm3, %v2988_v33, 0.0 }
 0x215   :  { %v3311_v28 = vpop.eup %3310 }
 0x216   :  { %v2956_v29 = vmul.f32 0.6931472, %v3311_v28 }
 0x218   :  { %v2957_v31 = vsub.f32 0.0, %v2956_v29 }
 0x21a   :  { %v2958_v32 = vsel %vm552_vm3, %v2957_v31, 0.0 }
 0x21b   :  { %2959 = vadd.xlane.f32.xlu0 %v2958_v32 }
 0x21f   :  { %2990 = vadd.xlane.f32.xlu0 %v2989_v34 }
 0x233   :  { %v555_v35 = vpop.xlane.xlu0 %554 }
 0x237   :  { %v558_v36 = vpop.xlane.xlu0 %557 }
 0x23f   :  { %v1027_v37 = vpop.xlane.xlu0 %1026  ;;  %v1030_v43 = vpop.xlane.xlu1 %1029 }
 0x24b   :  { %v1496_v38 = vpop.xlane.xlu0 %1495 }
 0x24f   :  { %v1499_v39 = vpop.xlane.xlu0 %1498 }
 0x257   :  { %v1965_v40 = vpop.xlane.xlu0 %1964 }
 0x258   :  { %v2903_v41 = vadd.f32 %v1965_v40, %v555_v35  ;;  %v2934_v42 = vadd.f32 %v1965_v40, %v1027_v37 }
 0x25a   :  { %v2904_v46 = vadd.f32 %v2903_v41, %v558_v36  ;;  %v2935_v47 = vadd.f32 %v2934_v42, %v1030_v43 }
 0x25b   :  { %v1968_v10 = vpop.xlane.xlu0 %1967 }
 0x25c   :  { %v2905_v48 = vadd.f32 %v2904_v46, %v1968_v10  ;;  %v2936_v49 = vadd.f32 %v2935_v47, %v1968_v10 }
 0x25e   :  { %3312 = vrcp.f32 %v2905_v48 }
 0x25f   :  { %3314 = vrcp.f32 %v2936_v49 }
 0x26b   :  { %v3313_v50 = vpop.eup %3312 }
 0x26c   :  { %v3315_v51 = vpop.eup %3314  ;;  %v2907_v54 = vmul.f32 %v3313_v50, %v2903_v41 }
 0x26d   :  { %v2938_v55 = vmul.f32 %v3315_v51, %v2934_v42 }
 0x26e   :  { %3316 = vlog2.f32 %v2907_v54 }
 0x26f   :  { %v2887_v6 = vpop.xlane.xlu0 %2886  ;;  %3318 = vlog2.f32 %v2938_v55 }
 0x270   :  { %v2965_v52 = vadd.f32 %v2887_v6, %v1496_v38 }
 0x272   :  { %v2966_v56 = vadd.f32 %v2965_v52, %v1499_v39 }
 0x273   :  { %v2890_v57 = vpop.xlane.xlu0 %2889 }
 0x274   :  { %v2967_v58 = vadd.f32 %v2966_v56, %v2890_v57 }
 0x276   :  { %3320 = vrcp.f32 %v2967_v58 }
 0x27b   :  { %v3317_v59 = vpop.eup %3316 }
 0x27c   :  { %v3319_v60 = vpop.eup %3318  ;;  %v2909_v62 = vmul.f32 0.6931472, %v3317_v59 }
 0x27d   :  { %v2940_v63 = vmul.f32 0.6931472, %v3319_v60 }
 0x27e   :  { %v2910_v0 = vsub.f32 0.0, %v2909_v62 }
 0x27f   :  { %v2941_v1 = vsub.f32 0.0, %v2940_v63 }
 0x280   :  { %v2912_v2 = vrot.slane %v2910_v0, 4 }
 0x281   :  { %v2943_v4 = vrot.slane %v2941_v1, 4 }
 0x282   :  { %v2913_v5 = vadd.f32 %v2912_v2, %v2910_v0 }
 0x283   :  { %v3321_v61 = vpop.eup %3320  ;;  %v2944_v7 = vadd.f32 %v2943_v4, %v2941_v1 }
 0x284   :  { %v2969_v45 = vmul.f32 %v3321_v61, %v2965_v52  ;;  %v2914_v11 = vrot.slane %v2913_v5, 2 }
 0x285   :  { %v2945_v12 = vrot.slane %v2944_v7, 2 }
 0x286   :  { %3322 = vlog2.f32 %v2969_v45  ;;  %v2915_v15 = vadd.f32 %v2914_v11, %v2913_v5 }
 0x287   :  { %v2946_v16 = vadd.f32 %v2945_v12, %v2944_v7 }
 0x288   :  { %v2916_v18 = vrot.slane %v2915_v15, 1 }
 0x289   :  { %v2947_v44 = vrot.slane %v2946_v16, 1 }
 0x28a   :  { %v2917_v21 = vadd.f32 %v2916_v18, %v2915_v15 }
 0x28b   :  { %v2948_v53 = vadd.f32 %v2947_v44, %v2946_v16 }
 0x28c   :  { %v2918_v25 = vmul.f32 0.125, %v2917_v21 }
 0x28d   :  { %v2949_v26 = vmul.f32 0.125, %v2948_v53 }
 0x293   :  { %v3323_v8 = vpop.eup %3322 }
 0x294   :  { %v2971_v9 = vmul.f32 0.6931472, %v3323_v8 }
 0x296   :  { %v2972_v13 = vsub.f32 0.0, %v2971_v9 }
 0x298   :  { %v2974_v14 = vrot.slane %v2972_v13, 4  ;;  %v2929_v20 = vpop.xlane.xlu0 %2928 }
 0x299   :  { %v2931_v23 = vmul.f32 0.125, %v2929_v20 }
 0x29a   :  { %v2975_v17 = vadd.f32 %v2974_v14, %v2972_v13 }
 0x29b   :  { %v2932_v29 = vadd.f32 %v2931_v23, %v2918_v25 }
 0x29c   :  { %v2976_v3 = vrot.slane %v2975_v17, 2 }
 0x29d   :  { %v2933_v35 = vmul.f32 0.5, %v2932_v29 }
 0x29e   :  { %v2977_v19 = vadd.f32 %v2976_v3, %v2975_v17 }
 0x2a0   :  { %v2978_v22 = vrot.slane %v2977_v19, 1 }
 0x2a2   :  { %v2979_v28 = vadd.f32 %v2978_v22, %v2977_v19 }
 0x2a4   :  { %v2960_v24 = vpop.xlane.xlu0 %2959  ;;  %v2980_v33 = vmul.f32 0.125, %v2979_v28 }
 0x2a5   :  { %v2962_v27 = vmul.f32 0.125, %v2960_v24 }
 0x2a7   :  { %v2963_v30 = vadd.f32 %v2962_v27, %v2949_v26 }
 0x2a8   :  { %v2991_v31 = vpop.xlane.xlu0 %2990 }
 0x2a9   :  { %v2964_v32 = vmul.f32 0.5, %v2963_v30  ;;  %v2993_v34 = vmul.f32 0.125, %v2991_v31 }
 0x2ab   :  { %v2994_v36 = vadd.f32 %v2993_v34, %v2980_v33  ;;  %v2996_v37 = vadd.f32 %v2964_v32, %v2933_v35 }
 0x2ad   :  { %v2995_v38 = vmul.f32 0.5, %v2994_v36 }
 0x2af   :  { %v2997_v39 = vadd.f32 %v2996_v37, %v2995_v38 }
 0x2b1   :  { %2999 = vst.msk [vmem:[#allocation7] sm:$0x1] %vm2998_vm4, %v2997_v39 }
 0x2b2   :  { %3375 = shalt.err (!%p3372_p0)
}
 0x2b3   :  { %3009 = dma.vmem_to_hbm [thread:$0]  %s3007_s4, 16, %s3745_s5, [#allocation4]  }
 0x2b4   :  { %3388 = dma.done.wait [#allocation4], 16  }
 0x2b5   :  { %3389 = vsyncadd [#allocation4], 4294967280 }
 0x2b6   :  { %3013 = vsyncpa [#allocation3], 1 }
 0x2b7   :  { %3014 = vsyncpa [#allocation6], 1 }
 0x2b8   :  { %3015 = vsyncpa [#allocation4], 1 }

</bundles_post_ra>
